<compile_context>
chip_gen: v7x
topology: tpu7x:2x2x1
jax: 0.10.0
libtpu: 0.0.40
codegen_flags: <defaults>
</compile_context>

<pallas_src>
import math

import jax
import jax.numpy as jnp
from jax.experimental import pallas as pl
from jax.experimental.pallas import tpu as pltpu

_MiB = 1024 * 1024


def _round_up(n, m):
    return ((n + m - 1) // m) * m


# -----------------------------------------------------------------------------
# Kernels
# -----------------------------------------------------------------------------

def _tdvp_kernel_two(x_ref, wt_ref, ct_ref, o_ref):
    # (tm, in) @ (in, bond) -> f32 intermediate. Kept in f32 for the second dot
    # so accumulation accuracy does not depend on the weight compute dtype.
    t = jnp.dot(x_ref[...], wt_ref[...], preferred_element_type=jnp.float32)
    o_ref[...] = jnp.dot(t, ct_ref[...],
                         preferred_element_type=jnp.float32).astype(o_ref.dtype)


def _tdvp_kernel_folded(x_ref, w_ref, o_ref):
    # Single MXU pass against the pre-folded weight W = transform^T @ core^T.
    o_ref[...] = jnp.dot(x_ref[...], w_ref[...],
                         preferred_element_type=jnp.float32).astype(o_ref.dtype)


def _tdvp_kernel_blocked(x_ref, w_ref, o_ref, acc_ref):
    # Standard (i, j, k) blocked GEMM with an f32 VMEM accumulator (P3).
    @pl.when(pl.program_id(2) == 0)
    def _():
        acc_ref[...] = jnp.zeros_like(acc_ref)

    acc_ref[...] += jnp.dot(x_ref[...], w_ref[...],
                            preferred_element_type=jnp.float32)

    @pl.when(pl.program_id(2) == pl.num_programs(2) - 1)
    def _():
        o_ref[...] = acc_ref[...].astype(o_ref.dtype)


# -----------------------------------------------------------------------------
# VMEM budgeting / tiling helpers
# -----------------------------------------------------------------------------

def _vmem_budget_bytes():
    """Usable VMEM budget for this kernel, per TPU generation."""
    cap = None
    try:
        cap = int(getattr(pltpu.get_tpu_info(), "vmem_capacity_bytes"))
    except Exception:
        cap = None
    if cap is None or cap <= 0:
        cap = 64 * _MiB                       # conservative (v7x-sized) default
    if cap <= 64 * _MiB:
        # v7x-class part: never request all of physical VMEM; leave headroom
        # for compiler-internal scratch and the f32 intermediate.
        return max(min(cap - 12 * _MiB, 52 * _MiB), cap // 2)
    # 128 MiB parts (v5e / v6e): allow most of VMEM.
    return max(min(cap - 28 * _MiB, 100 * _MiB), cap // 2)


def _auto_tm(M, per_row_bytes, resident_bytes, vmem_budget, tm_cap=1024):
    """Largest multiple-of-8 row tile whose buffers + resident weights fit."""
    avail = vmem_budget - resident_bytes
    if avail <= 0:
        avail = vmem_budget // 2
    tm = (avail // max(per_row_bytes, 1)) // 8 * 8
    tm = max(8, min(tm, tm_cap))
    # Keep >= 2 grid blocks on large inputs so both v7x TensorCores get work.
    if M >= 1024:
        tm = min(tm, _round_up(pl.cdiv(M, 2), 8))
    if tm >= M:
        tm = M                                 # single full-dim block
    return max(tm, 1)


def _pick_tile(dim, pref=256):
    """N/K tile width: 256 feeds the full 256x256 MXU on v6e/v7x; 128 is fine
    on v5e; below 128 use the full (unpadded) dim (allowed by the block rule)."""
    if dim >= pref:
        return pref
    if dim >= 128:
        return 128
    return dim


# -----------------------------------------------------------------------------
# Wrapper
# -----------------------------------------------------------------------------

def tdvp_forward(x, transform_matrix, core_matrix, *, compute_dtype=None,
                 fold_weights=None, force_blocked=False, tm=None):
    """x: (..., in_features); transform: (bond, in); core: (out, bond)."""
    bond_dim, in_features = transform_matrix.shape
    out_features, bond_dim_c = core_matrix.shape
    assert bond_dim_c == bond_dim
    assert x.shape[-1] == in_features

    lead_shape = x.shape[:-1]
    M = math.prod(lead_shape) if lead_shape else 1
    out_dtype = x.dtype
    x2d = x.reshape(M, in_features)

    wt = transform_matrix.T            # (in, bond)
    ct = core_matrix.T                 # (bond, out)
    if compute_dtype is not None:
        # Only the (small) weights are cast; x is passed through untouched.
        # Casting a single-use f32 x in the wrapper would add a full HBM pass.
        wt = wt.astype(compute_dtype)
        ct = ct.astype(compute_dtype)

    dsz_x = jnp.dtype(x2d.dtype).itemsize
    dsz_w = jnp.dtype(wt.dtype).itemsize
    dsz_o = jnp.dtype(out_dtype).itemsize

    vmem_budget = _vmem_budget_bytes()
    weight_budget = vmem_budget // 3   # resident weights may use ~1/3 of VMEM

    folded_bytes = in_features * out_features * dsz_w
    two_bytes = (in_features * bond_dim + bond_dim * out_features) * dsz_w

    if fold_weights is None:
        fold_weights = (in_features * out_features
                        <= bond_dim * (in_features + out_features))

    use_blocked = bool(force_blocked)
    if not use_blocked:
        resident_need = folded_bytes if fold_weights else two_bytes
        use_blocked = resident_need > weight_budget

    if use_blocked:
        out2d = _tdvp_blocked(x2d, wt, ct, out_dtype, vmem_budget)
        return out2d.reshape(*lead_shape, out_features)

    # ---------------- resident-weights path ----------------
    if fold_weights:
        w = jnp.dot(wt, ct, preferred_element_type=jnp.float32).astype(wt.dtype)
        per_row = 2 * in_features * dsz_x + 2 * out_features * dsz_o
        resident = in_features * out_features * dsz_w
        kernel = _tdvp_kernel_folded
        weight_args = (w,)
        weight_specs = [pl.BlockSpec(memory_space=pltpu.MemorySpace.VMEM)]
        flops = 2 * M * in_features * out_features
    else:
        # Include the (tm, bond) f32 intermediate in the budget.
        per_row = (2 * in_features * dsz_x + 2 * out_features * dsz_o
                   + bond_dim * 4)
        resident = two_bytes
        kernel = _tdvp_kernel_two
        weight_args = (wt, ct)
        weight_specs = [pl.BlockSpec(memory_space=pltpu.MemorySpace.VMEM),
                        pl.BlockSpec(memory_space=pltpu.MemorySpace.VMEM)]
        flops = 2 * M * (in_features * bond_dim + bond_dim * out_features)

    tm_eff = tm if tm is not None else _auto_tm(M, per_row, resident, vmem_budget)
    tm_eff = min(tm_eff, M) if tm_eff >= M else max(8, (tm_eff // 8) * 8)
    grid = (pl.cdiv(M, tm_eff),)

    step_bytes = tm_eff * per_row + resident
    vmem_limit = int(min(vmem_budget, max(32 * _MiB, step_bytes + 8 * _MiB)))

    bytes_accessed = (grid[0] * tm_eff * in_features * dsz_x + resident
                      + grid[0] * tm_eff * out_features * dsz_o)
    cost = pl.CostEstimate(flops=flops, transcendentals=0,
                           bytes_accessed=int(bytes_accessed))

    out2d = pl.pallas_call(
        kernel,
        out_shape=jax.ShapeDtypeStruct((M, out_features), out_dtype),
        grid_spec=pltpu.PrefetchScalarGridSpec(
            num_scalar_prefetch=0,
            grid=grid,
            in_specs=[pl.BlockSpec((tm_eff, in_features), lambda i: (i, 0))]
                     + weight_specs,
            out_specs=pl.BlockSpec((tm_eff, out_features), lambda i: (i, 0)),
        ),
        compiler_params=pltpu.CompilerParams(
            dimension_semantics=("parallel",),
            vmem_limit_bytes=vmem_limit,
        ),
        cost_estimate=cost,
    )(x2d, *weight_args)

    return out2d.reshape(*lead_shape, out_features)


def _tdvp_blocked(x2d, wt, ct, out_dtype, vmem_budget):
    """Blocked-GEMM fallback for weights too large to keep resident in VMEM."""
    # TODO(synk): when bond_dim << min(in, out) a two-stage blocked pipeline
    # (x@wt, then @ct) would save FLOPs over folding; this folded blocked GEMM
    # is the simple VMEM-safe fallback.
    M, in_features = x2d.shape
    out_features = ct.shape[1]
    w = jnp.dot(wt, ct, preferred_element_type=jnp.float32).astype(wt.dtype)

    dsz_x = jnp.dtype(x2d.dtype).itemsize
    dsz_w = jnp.dtype(w.dtype).itemsize
    dsz_o = jnp.dtype(out_dtype).itemsize

    tn = _pick_tile(out_features)
    tk = _pick_tile(in_features)
    tm = 256 if M >= 256 else M

    # The reduction (K) axis must not have garbage in ragged blocks: zero-pad
    # K up to a tile multiple (exact for matmul). M/N raggedness is safe
    # because the corresponding OOB output rows/cols are discarded on store.
    kp = _round_up(in_features, tk)
    if kp != in_features:
        x2d = jnp.pad(x2d, ((0, 0), (0, kp - in_features)))
        w = jnp.pad(w, ((0, kp - in_features), (0, 0)))

    gi, gj, gk = pl.cdiv(M, tm), pl.cdiv(out_features, tn), kp // tk
    step_bytes = (2 * (tm * tk * dsz_x + tk * tn * dsz_w + tm * tn * dsz_o)
                  + tm * tn * 4)
    vmem_limit = int(min(vmem_budget, max(32 * _MiB, step_bytes + 8 * _MiB)))

    cost = pl.CostEstimate(
        flops=2 * M * in_features * out_features,
        transcendentals=0,
        bytes_accessed=int(gi * gk * tm * tk * dsz_x + gj * gk * tk * tn * dsz_w
                           + gi * gj * tm * tn * dsz_o),
    )

    return pl.pallas_call(
        _tdvp_kernel_blocked,
        out_shape=jax.ShapeDtypeStruct((M, out_features), out_dtype),
        grid_spec=pltpu.PrefetchScalarGridSpec(
            num_scalar_prefetch=0,
            grid=(gi, gj, gk),
            in_specs=[pl.BlockSpec((tm, tk), lambda i, j, k: (i, k)),
                      pl.BlockSpec((tk, tn), lambda i, j, k: (k, j))],
            out_specs=pl.BlockSpec((tm, tn), lambda i, j, k: (i, j)),
            scratch_shapes=[pltpu.VMEM((tm, tn), jnp.float32)],
        ),
        compiler_params=pltpu.CompilerParams(
            dimension_semantics=("parallel", "parallel", "arbitrary"),
            vmem_limit_bytes=vmem_limit,
        ),
        cost_estimate=cost,
    )(x2d, w)


# -----------------------------------------------------------------------------
# Parameter init (matches nn.init.kaiming_uniform_(a=sqrt(5)))
# -----------------------------------------------------------------------------

def init_tdvp_params(key, in_features, out_features, bond_dim):
    bond_dim = min(bond_dim, min(in_features, out_features))
    k_core, k_transform = jax.random.split(key)

    def kaiming_uniform(k, shape):
        fan_in = shape[1]
        gain = math.sqrt(2.0 / (1.0 + 5.0))      # a = sqrt(5)
        bound = gain * math.sqrt(3.0 / fan_in)   # = sqrt(1/fan_in)
        return jax.random.uniform(k, shape, jnp.float32, -bound, bound)

    core_matrix = kaiming_uniform(k_core, (out_features, bond_dim))
    transform_matrix = kaiming_uniform(k_transform, (bond_dim, in_features))
    return core_matrix, transform_matrix


if __name__ == "__main__":
    key = jax.random.PRNGKey(0)
    k_x, k_x2, k_x3, k_p = jax.random.split(key, 4)

    batch, seq = 2, 8
    in_features, out_features, bond_dim = 32, 32, 16

    core_matrix, transform_matrix = init_tdvp_params(
        k_p, in_features, out_features, bond_dim)

    def ref(xv):
        return (xv @ transform_matrix.T) @ core_matrix.T

    # 1) Default path (folds the weights for these dims: single MXU matmul,
    #    resident weight, no wrapper pads).
    x = jax.random.normal(k_x, (batch, seq, in_features), jnp.float32)
    y = jax.block_until_ready(tdvp_forward(x, transform_matrix, core_matrix))
    assert y.shape == (batch, seq, out_features)
    assert jnp.allclose(y, ref(x), atol=2e-5, rtol=1e-4)

    # 2) Two-matmul resident-weights path, ragged M (no divisibility needed).
    x2 = jax.random.normal(k_x2, (5, 7, in_features), jnp.float32)
    y2 = jax.block_until_ready(
        tdvp_forward(x2, transform_matrix, core_matrix, fold_weights=False))
    assert y2.shape == (5, 7, out_features)
    assert jnp.allclose(y2, ref(x2), atol=2e-5, rtol=1e-4)

    # 3) Blocked-GEMM fallback (used when weights exceed the VMEM residency
    #    budget); forced here at small shapes for coverage.
    x3 = jax.random.normal(k_x3, (3, 11, in_features), jnp.float32)
    y3 = jax.block_until_ready(
        tdvp_forward(x3, transform_matrix, core_matrix, force_blocked=True))
    assert y3.shape == (3, 11, out_features)
    assert jnp.allclose(y3, ref(x3), atol=2e-5, rtol=1e-4)

    print("KERNEL_OK")
</pallas_src>

<mosaic_0001>
module attributes {stable_mosaic.version = 11 : i64} {
  func.func @_tdvp_kernel_folded(%arg0: i32, %arg1: memref<16x32xf32, #tpu.memory_space<vmem>>, %arg2: memref<32x32xf32, #tpu.memory_space<vmem>>, %arg3: memref<16x32xf32, #tpu.memory_space<vmem>>) attributes {dimension_semantics = [#tpu.dimension_semantics<parallel>], iteration_bounds = array<i64: 1>, scalar_prefetch = 0 : i64, scratch_operands = 0 : i64, tpu.core_type = #tpu.core_type<tc>, window_params = [{transform_indices = @transform_0, window_bounds = array<i64: 16, 32>}, {pipeline_mode = #tpu.pipeline_mode<synchronous>, transform_indices = @transform_1, window_bounds = array<i64: 32, 32>}, {transform_indices = @transform_2, window_bounds = array<i64: 16, 32>}]} {
    %c0 = arith.constant 0 : index
    %c0_0 = arith.constant 0 : index
    %0 = vector.load %arg1[%c0, %c0_0] : memref<16x32xf32, #tpu.memory_space<vmem>>, vector<16x32xf32>
    %c0_1 = arith.constant 0 : index
    %c0_2 = arith.constant 0 : index
    %1 = vector.load %arg2[%c0_1, %c0_2] : memref<32x32xf32, #tpu.memory_space<vmem>>, vector<32x32xf32>
    %cst = arith.constant dense<0.000000e+00> : vector<16x32xf32>
    %2 = tpu.matmul %0, %1, %cst {dimension_numbers = #tpu.dot_dimension_numbers<[1], [0], [0], [1], [0, 0, 1, 1], [], []>} : vector<16x32xf32>, vector<32x32xf32>, vector<16x32xf32> -> vector<16x32xf32>
    %c0_3 = arith.constant 0 : index
    %c0_4 = arith.constant 0 : index
    %3 = vector.load %arg3[%c0_3, %c0_4] : memref<16x32xf32, #tpu.memory_space<vmem>>, vector<16x32xf32>
    tpu.vector_store %arg3[%c0_3, %c0_4], %2 {strides = array<i32>} : memref<16x32xf32, #tpu.memory_space<vmem>>, vector<16x32xf32>,
    return
  }
  func.func @transform_0(%arg0: i32) -> (i32, i32) {
    %c0_i32 = arith.constant 0 : i32
    %c0_i32_0 = arith.constant 0 : i32
    return %arg0, %c0_i32 : i32, i32
  }
  func.func @transform_1(%arg0: i32) -> (i32, i32) {
    %c0_i32 = arith.constant 0 : i32
    %c0_i32_0 = arith.constant 0 : i32
    %c0_i32_1 = arith.constant 0 : i32
    return %c0_i32, %c0_i32_0 : i32, i32
  }
  func.func @transform_2(%arg0: i32) -> (i32, i32) {
    %c0_i32 = arith.constant 0 : i32
    %c0_i32_0 = arith.constant 0 : i32
    return %arg0, %c0_i32 : i32, i32
  }
}

</mosaic_0001>

<bundles_post_ra>
// kernel: tpu_custom_call.1
= control target key start
LH: loop header
LB: loop body
LE: loop exit
PB: predicated region body
PF: predicated region fallthrough
CT: control target
= control target key end

     0   :  { %7 = vsyncpa [#allocation3], 0  ;;  %s321_s0 = inlined_call_operand.hbm [shape: f32[16,32], index: 0, kind: input, shape index: {}]   ;;  %s322_s1 = inlined_call_operand.hbm [shape: f32[32,32], index: 1, kind: input, shape index: {}]   ;;  %s323_s2 = inlined_call_operand.hbm [shape: f32[16,32], index: 2, kind: output, shape index: {}]  }
   0x1   :  { %8 = vsyncpa [#allocation6], 0 }
   0x2   :  { %9 = vsyncpa [#allocation4], 0  ;;  %s252_s9 = smov [#allocation2]   ;;  %s180_s13 = scalar_lea.hbm %s321_s0, 256 }
   0x3   :  { %s15_s10 = sshll.u32 %s252_s9, 4  ;;  %p181_p0 = scmp.ne.s32.totalorder %s321_s0, %s180_s13  ;;  %s16_s10 = int_to_ptr.vmem [resolvable:$true] %s15_s10 }
   0x4   :  { %p184_p1 = scmp.lt.u32.totalorder %s180_s13, %s321_s0 }
   0x6   :  { %p186_p2 = pnand %p184_p1, %p181_p0 }
   0x8   :  { %189 = shalt.err (!%p186_p2)
}
   0x9   :  { %s190_s18 = scalar_lea.vmem %s16_s10, 256  ;;  %p195_p4 = scmp.lt.s32.totalorder %s16_s10, %s16_s10 }
   0xa   :  { %p191_p3 = scmp.ne.s32.totalorder %s16_s10, %s190_s18  ;;  %p196_p5 = scmp.lt.s32.totalorder %s190_s18, %s190_s18 }
   0xc   :  { %p197_p6 = por %p196_p5, %p195_p4 }
   0xe   :  { %p198_p7 = pnand %p197_p6, %p191_p3 }
  0x10   :  { %201 = shalt.err (!%p198_p7)
}
  0x11   :  { %s253_s19 = smov 128   ;;  %s254_s20 = smov 8  }
  0x12   :  { %21 = dma.hbm_to_vmem [thread:$0]  %s321_s0, 256, %s16_s10, [#allocation3], %s253_s19, %s253_s19, %s254_s20  }
  0x13   :  { %s255_s23 = smov [#allocation5]   ;;  %s202_s27 = scalar_lea.hbm %s322_s1, 512 }
  0x14   :  { %s27_s24 = sshll.u32 %s255_s23, 4  ;;  %p203_p8 = scmp.ne.s32.totalorder %s322_s1, %s202_s27  ;;  %s28_s24 = int_to_ptr.vmem [resolvable:$true] %s27_s24 }
  0x15   :  { %p206_p9 = scmp.lt.u32.totalorder %s202_s27, %s322_s1 }
  0x17   :  { %p208_p10 = pnand %p206_p9, %p203_p8 }
  0x19   :  { %211 = shalt.err (!%p208_p10)
}
  0x1a   :  { %s212_s4 = scalar_lea.vmem %s28_s24, 512  ;;  %p217_p12 = scmp.lt.s32.totalorder %s28_s24, %s28_s24 }
  0x1b   :  { %p213_p11 = scmp.ne.s32.totalorder %s28_s24, %s212_s4  ;;  %p218_p13 = scmp.lt.s32.totalorder %s212_s4, %s212_s4 }
  0x1d   :  { %p219_p0 = por %p218_p13, %p217_p12 }
  0x1f   :  { %p220_p1 = pnand %p219_p0, %p213_p11 }
  0x21   :  { %223 = shalt.err (!%p220_p1)
}
  0x22   :  { %33 = dma.hbm_to_vmem [thread:$0]  %s322_s1, 512, %s28_s24, [#allocation6], %s253_s19, %s253_s19, %s254_s20  }
  0x23   :  { %246 = dma.done.wait [#allocation3], 256  }
  0x24   :  { %247 = vsyncadd [#allocation3], 4294967040 }
  0x25   :  { %248 = dma.done.wait [#allocation6], 512  }
  0x26   :  { %249 = vsyncadd [#allocation6], 4294966784  ;;  %vm46_vm0 = vcmask 261120   ;;  %v42_v0 = vld [vmem:[#allocation5] sm:$0xff]  ;;  %v43_v1 = vld [vmem:[#allocation5 + $0x8] sm:$0xff]  ;;  %s256_s1 = smov [#allocation7]  }
  0x27   :  { %v44_v2 = vld [vmem:[#allocation5 + $0x10] sm:$0xff]  ;;  %v167_v3 = vpack.c.bf16 %v43_v1, %v42_v0  ;;  %v45_v4 = vld [vmem:[#allocation5 + $0x18] sm:$0xff]  ;;  %s135_s6 = sshll.u32 %s256_s1, 4  ;;  %s136_s6 = int_to_ptr.vmem [resolvable:$true] %s135_s6 }
  0x28   :  { %v40_v5 = vld [vmem:[#allocation2] sm:$0xff]  ;;  %v171_v6 = vpack.c.bf16 %v45_v4, %v44_v2  ;;  %v41_v7 = vld [vmem:[#allocation2 + $0x8] sm:$0xff]  ;;  %s224_s7 = scalar_lea.vmem %s136_s6, 256  ;;  %p229_p3 = scmp.lt.s32.totalorder %s136_s6, %s136_s6 }
  0x29   :  { %164 = vmatprep.mubr.msk.f32.mxu0 %vm46_vm0, %v40_v5  ;;  %168 = vmatprep.subr.bf16.mxu0 %v167_v3  ;;  %p225_p2 = scmp.ne.s32.totalorder %s136_s6, %s224_s7  ;;  %p230_p4 = scmp.lt.s32.totalorder %s224_s7, %s224_s7 }
  0x2a   :  { %170 = vmatpush3.bf16.msra.mxu0 %v167_v3 }
  0x2b   :  { %172 = vmatprep.subr.bf16.mxu0 %v171_v6  ;;  %p231_p5 = por %p230_p4, %p229_p3 }
  0x2d   :  { %p232_p6 = pnand %p231_p5, %p225_p2 }
  0x2e   :  { %174 = vmatpush3.bf16.msra.mxu0 %v171_v6 }
  0x31   :  { %165 = vmatmul.mubr.msk.f32.vlgmr.msra.gmra.mrb[0].mxu0 %vm46_vm0, %v41_v7 }
 0x104   :  { %v166_v8 = vpop.f32.mrb[0].mxu0 }
 0x105   :  { %129 = vst.msk [vmem:[#allocation7 + $0x8] sm:$0xff] %vm46_vm0, %v166_v8  ;;  %v119_v9 = vpop.f32.mrb[1].mxu0 }
 0x106   :  { %128 = vst.msk [vmem:[#allocation7] sm:$0xff] %vm46_vm0, %v119_v9 }
 0x107   :  { %235 = shalt.err (!%p232_p6)
}
 0x108   :  { %s236_s10 = scalar_lea.hbm %s323_s2, 256 }
 0x109   :  { %p237_p7 = scmp.ne.s32.totalorder %s323_s2, %s236_s10  ;;  %p240_p8 = scmp.lt.u32.totalorder %s236_s10, %s323_s2 }
 0x10b   :  { %p242_p9 = pnand %p240_p8, %p237_p7 }
 0x10d   :  { %245 = shalt.err (!%p242_p9)
}
 0x10e   :  { %141 = dma.vmem_to_hbm [thread:$0]  %s136_s6, 256, %s323_s2, [#allocation4], %s253_s19, %s253_s19, %s254_s20  }
 0x10f   :  { %250 = dma.done.wait [#allocation4], 256  }
 0x110   :  { %251 = vsyncadd [#allocation4], 4294967040 }
 0x111   :  { %145 = vsyncpa [#allocation3], 1 }
 0x112   :  { %146 = vsyncpa [#allocation6], 1 }
 0x113   :  { %147 = vsyncpa [#allocation4], 1 }

</bundles_post_ra>
